<compile_context>
chip_gen: v7x
topology: tpu7x:2x2x1
jax: 0.10.0
libtpu: 0.0.40
codegen_flags: <defaults>
</compile_context>

<pallas_src>
import functools

import jax
import jax.numpy as jnp
from jax import lax
from jax.experimental import pallas as pl
from jax.experimental.pallas import tpu as pltpu

_T = 3.0
_EPS = 1e-7


def _kl_partial_kernel(pred_ref, label_ref, out_ref, *, batch_total, block_rows):
    inv_t = jnp.float32(1.0 / _T)

    p = pred_ref[...].astype(jnp.float32) * inv_t   # pred / T
    l = label_ref[...].astype(jnp.float32) * inv_t  # label / T

    # log_softmax(pred / T, axis=-1), numerically stable.
    p_max = jnp.max(p, axis=-1, keepdims=True)
    p_shift = p - p_max
    log_z_p = jnp.log(jnp.sum(jnp.exp(p_shift), axis=-1, keepdims=True))
    log_predict = p_shift - log_z_p

    # softmax(label / T, axis=-1) + eps.
    # Divide replaced with per-row reciprocal ([TB,1]) + elementwise multiply.
    l_max = jnp.max(l, axis=-1, keepdims=True)
    exp_l = jnp.exp(l - l_max)
    l_sum = jnp.sum(exp_l, axis=-1, keepdims=True)
    target = exp_l * (jnp.float32(1.0) / l_sum) + jnp.float32(_EPS)

    # Per-row KL contribution: sum_c target * (log(target) - log_predict).
    # (log(target) kept on softmax+eps for exact parity with the PyTorch module.)
    per_row = jnp.sum(target * (jnp.log(target) - log_predict),
                      axis=-1, keepdims=True)                       # (TB, 1)

    # Mask rows that are batch padding (global row index >= true batch size).
    row_ids = (pl.program_id(0) * block_rows
               + lax.broadcasted_iota(jnp.int32, (block_rows, 1), 0))
    per_row = jnp.where(row_ids < batch_total, per_row, 0.0)

    partial = jnp.sum(per_row)                                      # scalar

    # Lane-dense (1, 128) output row: partial sum in lane 0, zeros elsewhere.
    lane = lax.broadcasted_iota(jnp.int32, (1, 128), 1)
    out_ref[...] = jnp.where(lane == 0, partial, 0.0)


def _round_up(x, m):
    return (x + m - 1) // m * m


def _choose_block_rows(batch, classes):
    # Keep 2 inputs x 2 pipeline buffers x TB x C x 4B under ~8 MiB so the
    # kernel fits every generation's scoped-VMEM default (16 MiB on v5e,
    # 32 MiB on v6e/v7x) without raising vmem_limit_bytes.
    budget_bytes = 8 * 1024 * 1024
    tb = budget_bytes // (2 * 2 * 4 * max(classes, 1))
    tb = min(tb, 512, _round_up(batch, 8))
    tb = max(8, (tb // 8) * 8)
    return tb


def kl_loss(pred, label):
    """Pallas TPU implementation of KLLoss.forward(pred, label)."""
    assert pred.shape == label.shape and pred.ndim == 2
    batch, classes = pred.shape

    tb = _choose_block_rows(batch, classes)
    batch_pad = _round_up(batch, tb)
    num_blocks = batch_pad // tb
    if batch_pad != batch:
        pad = ((0, batch_pad - batch), (0, 0))
        pred = jnp.pad(pred, pad)
        label = jnp.pad(label, pad)

    kernel = functools.partial(
        _kl_partial_kernel, batch_total=batch, block_rows=tb)

    partials = pl.pallas_call(
        kernel,
        out_shape=jax.ShapeDtypeStruct((num_blocks, 128), jnp.float32),
        grid_spec=pltpu.PrefetchScalarGridSpec(
            num_scalar_prefetch=0,
            grid=(num_blocks,),
            in_specs=[
                pl.BlockSpec((tb, classes), lambda i: (i, 0)),
                pl.BlockSpec((tb, classes), lambda i: (i, 0)),
            ],
            out_specs=pl.BlockSpec((1, 128), lambda i: (i, 0)),
        ),
        compiler_params=pltpu.CompilerParams(
            dimension_semantics=("parallel",)),
    )(pred, label)

    # Final reduction + normalization in XLA, using the TRUE batch size.
    # TODO(synk): for vocab-scale C (>8-16K classes), also tile the class axis
    # with an online logsumexp instead of materializing the full [TB, C] block.
    return jnp.float32(_T * _T) * jnp.sum(partials) / jnp.float32(batch)


def _kl_loss_ref(pred, label):
    # Pure-JAX reference mirroring the PyTorch module exactly.
    T = 3.0
    predict = jax.nn.log_softmax(pred / T, axis=1)
    target = jax.nn.softmax(label / T, axis=1) + 1e-7
    B = pred.shape[0]
    return T * T * (jnp.sum(target * (jnp.log(target) - predict), axis=1).sum() / B)


if __name__ == "__main__":
    key = jax.random.PRNGKey(0)
    k1, k2 = jax.random.split(key)
    B, C = 8, 32  # small batch of class logits
    pred = jax.random.normal(k1, (B, C), dtype=jnp.float32)
    label = jax.random.normal(k2, (B, C), dtype=jnp.float32)

    loss = kl_loss(pred, label)
    jax.block_until_ready(loss)

    ref = _kl_loss_ref(pred, label)
    assert jnp.allclose(loss, ref, rtol=1e-5, atol=1e-5), (loss, ref)

    print("KERNEL_OK")
</pallas_src>

<mosaic_0001>
module attributes {stable_mosaic.version = 11 : i64} {
  func.func @_kl_partial_kernel(%arg0: i32, %arg1: memref<8x32xf32, #tpu.memory_space<vmem>>, %arg2: memref<8x32xf32, #tpu.memory_space<vmem>>, %arg3: memref<1x128xf32, #tpu.memory_space<vmem>>) attributes {dimension_semantics = [#tpu.dimension_semantics<parallel>], iteration_bounds = array<i64: 1>, scalar_prefetch = 0 : i64, scratch_operands = 0 : i64, tpu.core_type = #tpu.core_type<tc>, window_params = [{transform_indices = @transform_0, window_bounds = array<i64: 8, 32>}, {transform_indices = @transform_1, window_bounds = array<i64: 8, 32>}, {transform_indices = @transform_2, window_bounds = array<i64: 1, 128>}]} {
    %c0 = arith.constant 0 : index
    %c0_0 = arith.constant 0 : index
    %0 = vector.load %arg1[%c0, %c0_0] : memref<8x32xf32, #tpu.memory_space<vmem>>, vector<8x32xf32>
    %cst = arith.constant 0.333333343 : f32
    %1 = vector.broadcast %cst : f32 to vector<8x32xf32>
    %2 = arith.mulf %0, %1 : vector<8x32xf32>
    %c0_1 = arith.constant 0 : index
    %c0_2 = arith.constant 0 : index
    %3 = vector.load %arg2[%c0_1, %c0_2] : memref<8x32xf32, #tpu.memory_space<vmem>>, vector<8x32xf32>
    %cst_3 = arith.constant 0.333333343 : f32
    %4 = vector.broadcast %cst_3 : f32 to vector<8x32xf32>
    %5 = arith.mulf %3, %4 : vector<8x32xf32>
    %cst_4 = arith.constant dense<0xFF800000> : vector<8xf32>
    %6 = vector.multi_reduction <maximumf>, %2, %cst_4 [1] : vector<8x32xf32> to vector<8xf32>
    %7 = vector.shape_cast %6 : vector<8xf32> to vector<8x1xf32>
    %8 = vector.broadcast %7 : vector<8x1xf32> to vector<8x32xf32>
    %9 = arith.subf %2, %8 : vector<8x32xf32>
    %10 = math.exp %9 : vector<8x32xf32>
    %cst_5 = arith.constant dense<0.000000e+00> : vector<8xf32>
    %11 = vector.multi_reduction <add>, %10, %cst_5 [1] : vector<8x32xf32> to vector<8xf32>
    %12 = vector.shape_cast %11 : vector<8xf32> to vector<8x1xf32>
    %13 = math.log %12 : vector<8x1xf32>
    %14 = vector.broadcast %13 : vector<8x1xf32> to vector<8x32xf32>
    %15 = arith.subf %9, %14 : vector<8x32xf32>
    %cst_6 = arith.constant dense<0xFF800000> : vector<8xf32>
    %16 = vector.multi_reduction <maximumf>, %5, %cst_6 [1] : vector<8x32xf32> to vector<8xf32>
    %17 = vector.shape_cast %16 : vector<8xf32> to vector<8x1xf32>
    %18 = vector.broadcast %17 : vector<8x1xf32> to vector<8x32xf32>
    %19 = arith.subf %5, %18 : vector<8x32xf32>
    %20 = math.exp %19 : vector<8x32xf32>
    %cst_7 = arith.constant dense<0.000000e+00> : vector<8xf32>
    %21 = vector.multi_reduction <add>, %20, %cst_7 [1] : vector<8x32xf32> to vector<8xf32>
    %22 = vector.shape_cast %21 : vector<8xf32> to vector<8x1xf32>
    %cst_8 = arith.constant 1.000000e+00 : f32
    %23 = vector.broadcast %cst_8 : f32 to vector<8x1xf32>
    %24 = arith.divf %23, %22 : vector<8x1xf32>
    %25 = vector.broadcast %24 : vector<8x1xf32> to vector<8x32xf32>
    %26 = arith.mulf %20, %25 : vector<8x32xf32>
    %cst_9 = arith.constant 1.000000e-07 : f32
    %27 = vector.broadcast %cst_9 : f32 to vector<8x32xf32>
    %28 = arith.addf %26, %27 : vector<8x32xf32>
    %29 = math.log %28 : vector<8x32xf32>
    %30 = arith.subf %29, %15 : vector<8x32xf32>
    %31 = arith.mulf %28, %30 : vector<8x32xf32>
    %cst_10 = arith.constant dense<0.000000e+00> : vector<8xf32>
    %32 = vector.multi_reduction <add>, %31, %cst_10 [1] : vector<8x32xf32> to vector<8xf32>
    %33 = vector.shape_cast %32 : vector<8xf32> to vector<8x1xf32>
    %c8_i32 = arith.constant 8 : i32
    %34 = arith.muli %arg0, %c8_i32 : i32
    %35 = tpu.iota {dimensions = array<i32: 0>} : vector<8x1xi32>
    %36 = vector.broadcast %34 : i32 to vector<8x1xi32>
    %37 = arith.addi %36, %35 : vector<8x1xi32>
    %c8_i32_11 = arith.constant 8 : i32
    %38 = vector.broadcast %c8_i32_11 : i32 to vector<8x1xi32>
    %39 = arith.cmpi slt, %37, %38 : vector<8x1xi32>
    %cst_12 = arith.constant 0.000000e+00 : f32
    %40 = vector.broadcast %cst_12 : f32 to vector<8x1xf32>
    %41 = arith.select %39, %33, %40 : vector<8x1xi1>, vector<8x1xf32>
    %42 = vector.shape_cast %41 : vector<8x1xf32> to vector<1x8x1xf32>
    %cst_13 = arith.constant dense<0.000000e+00> : vector<1xf32>
    %43 = vector.multi_reduction <add>, %42, %cst_13 [1, 2] : vector<1x8x1xf32> to vector<1xf32>
    %44 = vector.shape_cast %43 : vector<1xf32> to vector<1x1x1xf32>
    %45 = vector.extract %44[0, 0, 0] : f32 from vector<1x1x1xf32>
    %46 = tpu.iota {dimensions = array<i32: 1>} : vector<1x128xi32>
    %c0_i32 = arith.constant 0 : i32
    %47 = vector.broadcast %c0_i32 : i32 to vector<1x128xi32>
    %48 = arith.cmpi eq, %46, %47 : vector<1x128xi32>
    %cst_14 = arith.constant 0.000000e+00 : f32
    %49 = vector.broadcast %45 : f32 to vector<1x128xf32>
    %50 = vector.broadcast %cst_14 : f32 to vector<1x128xf32>
    %51 = arith.select %48, %49, %50 : vector<1x128xi1>, vector<1x128xf32>
    %c0_15 = arith.constant 0 : index
    %c0_16 = arith.constant 0 : index
    %52 = vector.load %arg3[%c0_15, %c0_16] : memref<1x128xf32, #tpu.memory_space<vmem>>, vector<1x128xf32>
    tpu.vector_store %arg3[%c0_15, %c0_16], %51 {strides = array<i32>} : memref<1x128xf32, #tpu.memory_space<vmem>>, vector<1x128xf32>,
    return
  }
  func.func @transform_0(%arg0: i32) -> (i32, i32) {
    %c0_i32 = arith.constant 0 : i32
    %c0_i32_0 = arith.constant 0 : i32
    return %arg0, %c0_i32 : i32, i32
  }
  func.func @transform_1(%arg0: i32) -> (i32, i32) {
    %c0_i32 = arith.constant 0 : i32
    %c0_i32_0 = arith.constant 0 : i32
    return %arg0, %c0_i32 : i32, i32
  }
  func.func @transform_2(%arg0: i32) -> (i32, i32) {
    %c0_i32 = arith.constant 0 : i32
    %c0_i32_0 = arith.constant 0 : i32
    return %arg0, %c0_i32 : i32, i32
  }
}

</mosaic_0001>

<bundles_post_ra>
// kernel: tpu_custom_call.1
= control target key start
LH: loop header
LB: loop body
LE: loop exit
PB: predicated region body
PF: predicated region fallthrough
CT: control target
= control target key end

     0   :  { %7 = vsyncpa [#allocation3], 0  ;;  %s259_s0 = inlined_call_operand.hbm [shape: f32[8,32], index: 0, kind: input, shape index: {}]   ;;  %s260_s1 = inlined_call_operand.hbm [shape: f32[8,32], index: 1, kind: input, shape index: {}]   ;;  %s261_s2 = inlined_call_operand.hbm [shape: f32[1,128], index: 2, kind: output, shape index: {}]  }
   0x1   :  { %8 = vsyncpa [#allocation6], 0 }
   0x2   :  { %9 = vsyncpa [#allocation4], 0  ;;  %s200_s9 = smov [#allocation2]   ;;  %s201_s11 = smov [#allocation5]  }
   0x3   :  { %s16_s10 = sshll.u32 %s200_s9, 4  ;;  %s26_s12 = sshll.u32 %s201_s11, 4  ;;  %s17_s10 = int_to_ptr.vmem [resolvable:$true] %s16_s10  ;;  %s27_s12 = int_to_ptr.vmem [resolvable:$true] %s26_s12 }
   0x4   :  { %s128_s15 = scalar_lea.hbm %s259_s0, 128 }
   0x5   :  { %p129_p0 = scmp.ne.s32.totalorder %s259_s0, %s128_s15  ;;  %p132_p1 = scmp.lt.u32.totalorder %s128_s15, %s259_s0 }
   0x7   :  { %p134_p2 = pnand %p132_p1, %p129_p0 }
   0x9   :  { %137 = shalt.err (!%p134_p2)
}
   0xa   :  { %s138_s20 = scalar_lea.vmem %s17_s10, 128  ;;  %p143_p4 = scmp.lt.s32.totalorder %s17_s10, %s17_s10 }
   0xb   :  { %p139_p3 = scmp.ne.s32.totalorder %s17_s10, %s138_s20  ;;  %p144_p5 = scmp.lt.s32.totalorder %s138_s20, %s138_s20 }
   0xd   :  { %p145_p6 = por %p144_p5, %p143_p4 }
   0xf   :  { %p146_p7 = pnand %p145_p6, %p139_p3 }
  0x11   :  { %149 = shalt.err (!%p146_p7)
}
  0x12   :  { %19 = dma.hbm_to_vmem [thread:$0]  %s259_s0, 128, %s17_s10, [#allocation3]  }
  0x13   :  { %s150_s25 = scalar_lea.hbm %s260_s1, 128 }
  0x14   :  { %p151_p8 = scmp.ne.s32.totalorder %s260_s1, %s150_s25  ;;  %p154_p9 = scmp.lt.u32.totalorder %s150_s25, %s260_s1 }
  0x16   :  { %p156_p10 = pnand %p154_p9, %p151_p8 }
  0x18   :  { %159 = shalt.err (!%p156_p10)
}
  0x19   :  { %s160_s30 = scalar_lea.vmem %s27_s12, 128  ;;  %p165_p12 = scmp.lt.s32.totalorder %s27_s12, %s27_s12 }
  0x1a   :  { %p161_p11 = scmp.ne.s32.totalorder %s27_s12, %s160_s30  ;;  %p166_p13 = scmp.lt.s32.totalorder %s160_s30, %s160_s30 }
  0x1c   :  { %p167_p0 = por %p166_p13, %p165_p12 }
  0x1e   :  { %p168_p1 = pnand %p167_p0, %p161_p11 }
  0x20   :  { %171 = shalt.err (!%p168_p1)
}
  0x21   :  { %29 = dma.hbm_to_vmem [thread:$0]  %s260_s1, 128, %s27_s12, [#allocation6]  }
  0x22   :  { %194 = dma.done.wait [#allocation3], 128  }
  0x23   :  { %195 = vsyncadd [#allocation3], 4294967168 }
  0x24   :  { %196 = dma.done.wait [#allocation6], 128  }
  0x25   :  { %197 = vsyncadd [#allocation6], 4294967168  ;;  %v38_v0 = vld [vmem:[#allocation5] sm:$0xff]  ;;  %vm40_vm0 = vcmask 261120   ;;  %v36_v1 = vld [vmem:[#allocation2] sm:$0xff]  ;;  %vm80_vm1 = vcmask 7168   ;;  %v91_v38 = vlaneseq }
  0x26   :  { %v39_v2 = vmul.f32 0.33333334, %v38_v0  ;;  %v37_v3 = vmul.f32 0.33333334, %v36_v1  ;;  %s202_s1 = smov [#allocation7]  }
  0x27   :  { %v92_v39 = vand.u32 127, %v91_v38  ;;  %s103_s4 = sshll.u32 %s202_s1, 4  ;;  %s104_s4 = int_to_ptr.vmem [resolvable:$true] %s103_s4 }
  0x28   :  { %v53_v4 = vsel %vm40_vm0, %v39_v2, -inf  ;;  %v41_v5 = vsel %vm40_vm0, %v37_v3, -inf  ;;  %s172_s6 = scalar_lea.vmem %s104_s4, 16  ;;  %s176_s7 = scalar_lea.vmem %s104_s4, 32 }
  0x29   :  { %54 = vmax.xlane.f32.xlu0 %v53_v4  ;;  %vm93_vm2 = vcmp.eq.s32.totalorder %v92_v39, 0  ;;  %p173_p2 = scmp.ne.s32.totalorder %s104_s4, %s172_s6  ;;  %p177_p3 = scmp.lt.s32.totalorder %s104_s4, %s104_s4 }
  0x2a   :  { %p178_p4 = scmp.lt.s32.totalorder %s176_s7, %s172_s6 }
  0x2c   :  { %p179_p5 = por %p178_p4, %p177_p3 }
  0x2d   :  { %42 = vmax.xlane.f32.xlu0 %v41_v5 }
  0x2e   :  { %p180_p6 = pnand %p179_p5, %p173_p2 }
  0xb6   :  { %v55_v6 = vpop.xlane.xlu0 %54 }
  0xb7   :  { %v56_v7 = vsub.f32 %v39_v2, %v55_v6 }
  0xb9   :  { %v57_v8 = vmul.f32 1.442695, %v56_v7 }
  0xba   :  { %v43_v9 = vpop.xlane.xlu0 %42 }
  0xbb   :  { %118 = vpow2.f32 %v57_v8  ;;  %v44_v10 = vsub.f32 %v37_v3, %v43_v9 }
  0xbd   :  { %v45_v11 = vmul.f32 1.442695, %v44_v10 }
  0xbf   :  { %120 = vpow2.f32 %v45_v11 }
  0xc5   :  { %v119_v12 = vpop.eup %118 }
  0xc6   :  { %v59_v13 = vsel %vm40_vm0, %v119_v12, 0.0 }
  0xc7   :  { %60 = vadd.xlane.f32.xlu1 %v59_v13 }
  0xc9   :  { %v121_v14 = vpop.eup %120 }
  0xca   :  { %v47_v15 = vsel %vm40_vm0, %v121_v14, 0.0 }
  0xcb   :  { %48 = vadd.xlane.f32.xlu1 %v47_v15 }
 0x154   :  { %v61_v16 = vpop.xlane.xlu1 %60 }
 0x155   :  { %122 = vrcp.f32 %v61_v16 }
 0x158   :  { %v49_v17 = vpop.xlane.xlu1 %48 }
 0x159   :  { %124 = vlog2.f32 %v49_v17 }
 0x15f   :  { %v123_v18 = vpop.eup %122 }
 0x160   :  { %v64_v19 = vmul.f32 %v123_v18, %v119_v12 }
 0x162   :  { %v65_v20 = vadd.f32 1e-07, %v64_v19 }
 0x163   :  { %v125_v21 = vpop.eup %124 }
 0x164   :  { %126 = vlog2.f32 %v65_v20  ;;  %v51_v22 = vmul.f32 0.6931472, %v125_v21 }
 0x166   :  { %v52_v24 = vsub.f32 %v44_v10, %v51_v22 }
 0x16e   :  { %v127_v23 = vpop.eup %126 }
 0x16f   :  { %v67_v25 = vmul.f32 0.6931472, %v127_v23 }
 0x171   :  { %v68_v26 = vsub.f32 %v67_v25, %v52_v24 }
 0x173   :  { %v69_v27 = vmul.f32 %v68_v26, %v65_v20 }
 0x175   :  { %v70_v28 = vsel %vm40_vm0, %v69_v27, 0.0 }
 0x176   :  { %71 = vadd.xlane.f32.xlu0 %v70_v28 }
 0x203   :  { %v72_v29 = vpop.xlane.xlu0 %71 }
 0x204   :  { %v81_v30 = vsel %vm80_vm1, %v72_v29, 0.0 }
 0x205   :  { %82 = vadd.xlane.f32.xlu1 %v81_v30 }
 0x292   :  { %v83_v31 = vpop.xlane.xlu1 %82 }
 0x293   :  { %v84_v32 = vrot.slane %v83_v31, 4 }
 0x295   :  { %v85_v33 = vadd.f32 %v84_v32, %v83_v31 }
 0x297   :  { %v86_v34 = vrot.slane %v85_v33, 2 }
 0x299   :  { %v87_v35 = vadd.f32 %v86_v34, %v85_v33 }
 0x29b   :  { %v88_v36 = vrot.slane %v87_v35, 1 }
 0x29d   :  { %v89_v37 = vadd.f32 %v88_v36, %v87_v35 }
 0x29f   :  { %113 = vpush %v89_v37 }
 0x2d0   :  { %s114_s5 = spop %113 }
 0x2d1   :  { %v94_v40 = vstv %s114_s5 }
 0x2d2   :  { %v95_v41 = vsel %vm93_vm2, %v94_v40, 0.0 }
 0x2d3   :  { %96 = vst [vmem:[#allocation7] sm:$0x1] %v95_v41 }
 0x2d4   :  { %183 = shalt.err (!%p180_p6)
}
 0x2d5   :  { %s184_s10 = scalar_lea.hbm %s261_s2, 16 }
 0x2d6   :  { %p185_p7 = scmp.ne.s32.totalorder %s261_s2, %s184_s10  ;;  %p188_p8 = scmp.lt.u32.totalorder %s184_s10, %s261_s2 }
 0x2d8   :  { %p190_p9 = pnand %p188_p8, %p185_p7 }
 0x2da   :  { %193 = shalt.err (!%p190_p9)
}
 0x2db   :  { %106 = dma.vmem_to_hbm [thread:$0]  %s104_s4, 16, %s261_s2, [#allocation4]  }
 0x2dc   :  { %198 = dma.done.wait [#allocation4], 16  }
 0x2dd   :  { %199 = vsyncadd [#allocation4], 4294967280 }
 0x2de   :  { %110 = vsyncpa [#allocation3], 1 }
 0x2df   :  { %111 = vsyncpa [#allocation6], 1 }
 0x2e0   :  { %112 = vsyncpa [#allocation4], 1 }

</bundles_post_ra>
